<compile_context>
chip_gen: v7x
topology: tpu7x:2x2x1
jax: 0.10.0
libtpu: 0.0.40
codegen_flags: <defaults>
</compile_context>

<pallas_src>
import jax
import jax.numpy as jnp
from jax.experimental import pallas as pl
from jax.experimental.pallas import tpu as pltpu


def _naive_attention_kernel(out_ref, ctx_ref, attn_ref):
    # out_ref : (Bb, TQ, D)   decoder output tile
    # ctx_ref : (Bb, Lk, D)   encoder context tile (full Lk, full D)
    # attn_ref: (Bb, TQ, Lk)  softmax attention weights
    q = out_ref[...]
    k = ctx_ref[...]

    # scores = output @ context^T, batched, f32 accumulation on the MXU.
    scores = jnp.einsum("bqd,bkd->bqk", q, k,
                        preferred_element_type=jnp.float32)  # (Bb, TQ, Lk)

    # Numerically-stable softmax along the input_len axis
    # (matches F.softmax(attn.view(-1, input_size), dim=1)).
    m = jnp.max(scores, axis=-1, keepdims=True)
    e = jnp.exp(scores - m)
    denom = jnp.sum(e, axis=-1, keepdims=True)
    attn = e * pl.reciprocal(denom, approx=False)  # exact: keeps 1e-5 tolerance

    attn_ref[...] = attn.astype(attn_ref.dtype)


def _divisors_desc(n, multiple_of=1):
    return [d for d in range(n, 0, -1) if n % d == 0 and d % multiple_of == 0]


def _pick_tiles(B, Lq, Lk, D, in_itemsize, out_itemsize,
                budget_bytes=12 * 1024 * 1024):
    """Pick (Bb, TQ) so the double-buffered per-step footprint fits VMEM."""
    b_cands = [d for d in _divisors_desc(B) if d <= 8] or [B]
    # TQ must be a multiple of 8 or equal to the full Lq.
    q_cands = [d for d in _divisors_desc(Lq, 8) if d <= 256] or [Lq]

    def footprint(bb, tq):
        return 2 * (bb * tq * D * in_itemsize        # Q tile
                    + bb * Lk * D * in_itemsize      # K tile
                    + bb * tq * Lk * out_itemsize)   # attn tile

    bi, qi = 0, 0
    bb, tq = b_cands[bi], q_cands[qi]
    while footprint(bb, tq) > budget_bytes:
        if qi + 1 < len(q_cands):
            qi += 1
            tq = q_cands[qi]
        elif bi + 1 < len(b_cands):
            bi += 1
            bb = b_cands[bi]
        else:
            break
    return bb, tq


def naive_attention(output, context):
    """output: (B, Lq, D), context: (B, Lk, D) -> attn: (B, Lq, Lk)"""
    B, Lq, D = output.shape
    Bc, Lk, Dc = context.shape
    assert B == Bc and D == Dc

    out_dtype = output.dtype
    Bb, TQ = _pick_tiles(B, Lq, Lk, D,
                         in_itemsize=output.dtype.itemsize,
                         out_itemsize=jnp.dtype(out_dtype).itemsize)

    grid = (B // Bb, Lq // TQ)  # Lq-tile axis innermost -> K block reused

    return pl.pallas_call(
        _naive_attention_kernel,
        out_shape=jax.ShapeDtypeStruct((B, Lq, Lk), out_dtype),
        grid_spec=pltpu.PrefetchScalarGridSpec(
            num_scalar_prefetch=0,
            grid=grid,
            in_specs=[
                pl.BlockSpec((Bb, TQ, D), lambda b, q: (b, q, 0)),
                pl.BlockSpec((Bb, Lk, D), lambda b, q: (b, 0, 0)),
            ],
            out_specs=pl.BlockSpec((Bb, TQ, Lk), lambda b, q: (b, q, 0)),
        ),
        compiler_params=pltpu.CompilerParams(
            dimension_semantics=("parallel", "parallel"),
        ),
    )(output, context)


def _reference(output, context):
    scores = jnp.einsum("bqd,bkd->bqk",
                        output.astype(jnp.float32),
                        context.astype(jnp.float32))
    return jax.nn.softmax(scores, axis=-1)


if __name__ == "__main__":
    key = jax.random.PRNGKey(0)
    k1, k2 = jax.random.split(key)

    B, Lq, Lk, D = 2, 8, 8, 32
    output = jax.random.normal(k1, (B, Lq, D), dtype=jnp.float32)
    context = jax.random.normal(k2, (B, Lk, D), dtype=jnp.float32)

    attn = naive_attention(output, context)
    attn = jax.block_until_ready(attn)

    ref = _reference(output, context)
    assert attn.shape == (B, Lq, Lk)
    assert jnp.allclose(attn, ref, atol=1e-5, rtol=1e-5), "mismatch vs reference"
    # rows of a softmax sum to 1
    assert jnp.allclose(jnp.sum(attn, axis=-1), 1.0, atol=1e-5)

    print("KERNEL_OK")
</pallas_src>

<mosaic_0001>
module attributes {stable_mosaic.version = 11 : i64} {
  func.func @_naive_attention_kernel(%arg0: i32, %arg1: i32, %arg2: memref<2x8x32xf32, #tpu.memory_space<vmem>>, %arg3: memref<2x8x32xf32, #tpu.memory_space<vmem>>, %arg4: memref<2x8x8xf32, #tpu.memory_space<vmem>>) attributes {dimension_semantics = [#tpu.dimension_semantics<parallel>, #tpu.dimension_semantics<parallel>], iteration_bounds = array<i64: 1, 1>, scalar_prefetch = 0 : i64, scratch_operands = 0 : i64, tpu.core_type = #tpu.core_type<tc>, window_params = [{transform_indices = @transform_0, window_bounds = array<i64: 2, 8, 32>}, {transform_indices = @transform_1, window_bounds = array<i64: 2, 8, 32>}, {transform_indices = @transform_2, window_bounds = array<i64: 2, 8, 8>}]} {
    %c0 = arith.constant 0 : index
    %c0_0 = arith.constant 0 : index
    %c0_1 = arith.constant 0 : index
    %0 = vector.load %arg2[%c0, %c0_0, %c0_1] : memref<2x8x32xf32, #tpu.memory_space<vmem>>, vector<2x8x32xf32>
    %c0_2 = arith.constant 0 : index
    %c0_3 = arith.constant 0 : index
    %c0_4 = arith.constant 0 : index
    %1 = vector.load %arg3[%c0_2, %c0_3, %c0_4] : memref<2x8x32xf32, #tpu.memory_space<vmem>>, vector<2x8x32xf32>
    "tpu.trace_start"() <{level = 10 : i32, message = "bqd,bkd->bqk"}> : () -> ()
    %cst = arith.constant dense<0.000000e+00> : vector<2x8x8xf32>
    %2 = tpu.matmul %0, %1, %cst {dimension_numbers = #tpu.dot_dimension_numbers<[2], [2], [1], [1], [0, 0, 0, 1, 1, 1], [0], [0]>} : vector<2x8x32xf32>, vector<2x8x32xf32>, vector<2x8x8xf32> -> vector<2x8x8xf32>
    "tpu.trace_stop"() : () -> ()
    %cst_5 = arith.constant dense<0xFF800000> : vector<2x8xf32>
    %3 = vector.multi_reduction <maximumf>, %2, %cst_5 [2] : vector<2x8x8xf32> to vector<2x8xf32>
    %4 = vector.shape_cast %3 : vector<2x8xf32> to vector<2x8x1xf32>
    %5 = vector.broadcast %4 : vector<2x8x1xf32> to vector<2x8x8xf32>
    %6 = arith.subf %2, %5 : vector<2x8x8xf32>
    %7 = math.exp %6 : vector<2x8x8xf32>
    %cst_6 = arith.constant dense<0.000000e+00> : vector<2x8xf32>
    %8 = vector.multi_reduction <add>, %7, %cst_6 [2] : vector<2x8x8xf32> to vector<2x8xf32>
    %9 = vector.shape_cast %8 : vector<2x8xf32> to vector<2x8x1xf32>
    %10 = tpu.reciprocal %9 : vector<2x8x1xf32> -> vector<2x8x1xf32>
    %11 = vector.broadcast %10 : vector<2x8x1xf32> to vector<2x8x8xf32>
    %12 = arith.mulf %7, %11 : vector<2x8x8xf32>
    %c0_7 = arith.constant 0 : index
    %c0_8 = arith.constant 0 : index
    %c0_9 = arith.constant 0 : index
    %13 = vector.load %arg4[%c0_7, %c0_8, %c0_9] : memref<2x8x8xf32, #tpu.memory_space<vmem>>, vector<2x8x8xf32>
    tpu.vector_store %arg4[%c0_7, %c0_8, %c0_9], %12 {strides = array<i32>} : memref<2x8x8xf32, #tpu.memory_space<vmem>>, vector<2x8x8xf32>,
    return
  }
  func.func @transform_0(%arg0: i32, %arg1: i32) -> (i32, i32, i32) {
    %c0_i32 = arith.constant 0 : i32
    %c0_i32_0 = arith.constant 0 : i32
    return %arg0, %arg1, %c0_i32 : i32, i32, i32
  }
  func.func @transform_1(%arg0: i32, %arg1: i32) -> (i32, i32, i32) {
    %c0_i32 = arith.constant 0 : i32
    %c0_i32_0 = arith.constant 0 : i32
    %c0_i32_1 = arith.constant 0 : i32
    return %arg0, %c0_i32, %c0_i32_0 : i32, i32, i32
  }
  func.func @transform_2(%arg0: i32, %arg1: i32) -> (i32, i32, i32) {
    %c0_i32 = arith.constant 0 : i32
    %c0_i32_0 = arith.constant 0 : i32
    return %arg0, %arg1, %c0_i32 : i32, i32, i32
  }
}

</mosaic_0001>

<bundles_post_ra>
// kernel: tpu_custom_call.1
= control target key start
LH: loop header
LB: loop body
LE: loop exit
PB: predicated region body
PF: predicated region fallthrough
CT: control target
= control target key end

     0   :  { %7 = vsyncpa [#allocation3], 0  ;;  %s418_s0 = inlined_call_operand.hbm [shape: f32[2,8,32], index: 0, kind: input, shape index: {}]   ;;  %s419_s1 = inlined_call_operand.hbm [shape: f32[2,8,32], index: 1, kind: input, shape index: {}]   ;;  %s420_s2 = inlined_call_operand.hbm [shape: f32[2,8,8], index: 2, kind: output, shape index: {}]  }
   0x1   :  { %8 = vsyncpa [#allocation6], 0 }
   0x2   :  { %9 = vsyncpa [#allocation4], 0  ;;  %s345_s9 = smov [#allocation2]   ;;  %s273_s13 = scalar_lea.hbm %s418_s0, 256 }
   0x3   :  { %s15_s10 = sshll.u32 %s345_s9, 4  ;;  %p274_p0 = scmp.ne.s32.totalorder %s418_s0, %s273_s13  ;;  %s16_s10 = int_to_ptr.vmem [resolvable:$true] %s15_s10 }
   0x4   :  { %p277_p1 = scmp.lt.u32.totalorder %s273_s13, %s418_s0 }
   0x6   :  { %p279_p2 = pnand %p277_p1, %p274_p0 }
   0x8   :  { %282 = shalt.err (!%p279_p2)
}
   0x9   :  { %s283_s18 = scalar_lea.vmem %s16_s10, 256  ;;  %p288_p4 = scmp.lt.s32.totalorder %s16_s10, %s16_s10 }
   0xa   :  { %p284_p3 = scmp.ne.s32.totalorder %s16_s10, %s283_s18  ;;  %p289_p5 = scmp.lt.s32.totalorder %s283_s18, %s283_s18 }
   0xc   :  { %p290_p6 = por %p289_p5, %p288_p4 }
   0xe   :  { %p291_p7 = pnand %p290_p6, %p284_p3 }
  0x10   :  { %294 = shalt.err (!%p291_p7)
}
  0x11   :  { %s346_s19 = smov 128   ;;  %s347_s20 = smov 8  }
  0x12   :  { %21 = dma.hbm_to_vmem [thread:$0]  %s418_s0, 256, %s16_s10, [#allocation3], %s346_s19, %s346_s19, %s347_s20  }
  0x13   :  { %s348_s23 = smov [#allocation5]   ;;  %s295_s27 = scalar_lea.hbm %s419_s1, 256 }
  0x14   :  { %s27_s24 = sshll.u32 %s348_s23, 4  ;;  %p296_p8 = scmp.ne.s32.totalorder %s419_s1, %s295_s27  ;;  %s28_s24 = int_to_ptr.vmem [resolvable:$true] %s27_s24 }
  0x15   :  { %p299_p9 = scmp.lt.u32.totalorder %s295_s27, %s419_s1 }
  0x17   :  { %p301_p10 = pnand %p299_p9, %p296_p8 }
  0x19   :  { %304 = shalt.err (!%p301_p10)
}
  0x1a   :  { %s305_s4 = scalar_lea.vmem %s28_s24, 256  ;;  %p310_p12 = scmp.lt.s32.totalorder %s28_s24, %s28_s24 }
  0x1b   :  { %p306_p11 = scmp.ne.s32.totalorder %s28_s24, %s305_s4  ;;  %p311_p13 = scmp.lt.s32.totalorder %s305_s4, %s305_s4 }
  0x1d   :  { %p312_p0 = por %p311_p13, %p310_p12 }
  0x1f   :  { %p313_p1 = pnand %p312_p0, %p306_p11 }
  0x21   :  { %316 = shalt.err (!%p313_p1)
}
  0x22   :  { %33 = dma.hbm_to_vmem [thread:$0]  %s419_s1, 256, %s28_s24, [#allocation6], %s346_s19, %s346_s19, %s347_s20  }
  0x23   :  { %339 = dma.done.wait [#allocation3], 256  }
  0x24   :  { %340 = vsyncadd [#allocation3], 4294967040 }
  0x25   :  { %341 = dma.done.wait [#allocation6], 256  }
  0x26   :  { %342 = vsyncadd [#allocation6], 4294967040  ;;  %v349_v0 = vmov 0.0   ;;  %vm350_vm0 = vmmov 0   ;;  %vm44_vm1 = vcmask 261120   ;;  %v42_v1 = vld [vmem:[#allocation5] sm:$0xff] }
  0x27   :  { %248 = vmatprep.subr.mxu0 %v349_v0  ;;  %250 = vmatprep.mubr.msk.f32.mxu0 %vm350_vm0, %v349_v0  ;;  %v43_v2 = vld [vmem:[#allocation5 + $0x8] sm:$0xff]  ;;  %v40_v3 = vld [vmem:[#allocation2] sm:$0xff]  ;;  %v41_v4 = vld [vmem:[#allocation2 + $0x8] sm:$0xff]  ;;  %vm197_vm2 = vcmask 64512   ;;  %s351_s1 = smov [#allocation7]  }
  0x28   :  { %253 = vmatprep.subr.mxu1 %v349_v0  ;;  %255 = vmatprep.mubr.msk.f32.mxu1 %vm350_vm0, %v349_v0  ;;  %s227_s6 = sshll.u32 %s351_s1, 4  ;;  %s228_s6 = int_to_ptr.vmem [resolvable:$true] %s227_s6 }
  0x29   :  { %249 = vmatpush3.xpose.msk.msra.mxu0 %vm44_vm1, %v42_v1  ;;  %254 = vmatpush3.xpose.msk.msra.mxu1 %vm44_vm1, %v43_v2  ;;  %s317_s7 = scalar_lea.vmem %s228_s6, 256  ;;  %p322_p3 = scmp.lt.s32.totalorder %s228_s6, %s228_s6 }
  0x2a   :  { %p318_p2 = scmp.ne.s32.totalorder %s228_s6, %s317_s7  ;;  %p323_p4 = scmp.lt.s32.totalorder %s317_s7, %s317_s7 }
  0x2c   :  { %251 = vmatmul.mubr.msk.f32.vlgmr.msra.gmra.mrb[0].mxu0 %vm44_vm1, %v40_v3  ;;  %256 = vmatmul.mubr.msk.f32.vlgmr.msra.gmra.mrb[0].mxu1 %vm44_vm1, %v41_v4  ;;  %p324_p5 = por %p323_p4, %p322_p3 }
  0x2e   :  { %p325_p6 = pnand %p324_p5, %p318_p2 }
  0xff   :  { %v117_v5 = vpop.f32.mrb[0].mxu0  ;;  %v193_v6 = vpop.f32.mrb[0].mxu1 }
 0x100   :  { %v252_v7 = vpop.f32.mrb[1].mxu0  ;;  %v198_v8 = vsel %vm197_vm2, %v117_v5, -inf  ;;  %v257_v9 = vpop.f32.mrb[1].mxu1  ;;  %v201_v10 = vsel %vm197_vm2, %v193_v6, -inf }
 0x101   :  { %199 = vmax.xlane.f32.xlu0 %v198_v8 }
 0x105   :  { %202 = vmax.xlane.f32.xlu0 %v201_v10 }
 0x18e   :  { %v200_v11 = vpop.xlane.xlu0 %199 }
 0x18f   :  { %v204_v12 = vsub.f32 %v117_v5, %v200_v11 }
 0x191   :  { %v206_v13 = vmul.f32 1.442695, %v204_v12 }
 0x192   :  { %v203_v14 = vpop.xlane.xlu0 %202 }
 0x193   :  { %265 = vpow2.f32 %v206_v13  ;;  %v205_v15 = vsub.f32 %v193_v6, %v203_v14 }
 0x195   :  { %v208_v16 = vmul.f32 1.442695, %v205_v15 }
 0x197   :  { %267 = vpow2.f32 %v208_v16 }
 0x19d   :  { %v266_v17 = vpop.eup %265 }
 0x19e   :  { %v210_v18 = vsel %vm197_vm2, %v266_v17, 0.0 }
 0x19f   :  { %211 = vadd.xlane.f32.xlu1 %v210_v18 }
 0x1a1   :  { %v268_v19 = vpop.eup %267 }
 0x1a2   :  { %v213_v20 = vsel %vm197_vm2, %v268_v19, 0.0 }
 0x1a3   :  { %214 = vadd.xlane.f32.xlu1 %v213_v20 }
 0x22c   :  { %v212_v21 = vpop.xlane.xlu1 %211 }
 0x22d   :  { %269 = vrcp.f32 %v212_v21 }
 0x230   :  { %v215_v22 = vpop.xlane.xlu1 %214 }
 0x231   :  { %271 = vrcp.f32 %v215_v22 }
 0x237   :  { %v270_v23 = vpop.eup %269 }
 0x238   :  { %v218_v24 = vmul.f32 %v270_v23, %v266_v17 }
 0x23a   :  { %220 = vst.msk [vmem:[#allocation7] sm:$0xff] %vm197_vm2, %v218_v24 }
 0x23b   :  { %v272_v25 = vpop.eup %271 }
 0x23c   :  { %v219_v26 = vmul.f32 %v272_v25, %v268_v19 }
 0x23e   :  { %221 = vst.msk [vmem:[#allocation7 + $0x8] sm:$0xff] %vm197_vm2, %v219_v26 }
 0x23f   :  { %328 = shalt.err (!%p325_p6)
}
 0x240   :  { %s329_s10 = scalar_lea.hbm %s420_s2, 256 }
 0x241   :  { %p330_p7 = scmp.ne.s32.totalorder %s420_s2, %s329_s10  ;;  %p333_p8 = scmp.lt.u32.totalorder %s329_s10, %s420_s2 }
 0x243   :  { %p335_p9 = pnand %p333_p8, %p330_p7 }
 0x245   :  { %338 = shalt.err (!%p335_p9)
}
 0x246   :  { %233 = dma.vmem_to_hbm [thread:$0]  %s228_s6, 256, %s420_s2, [#allocation4], %s346_s19, %s346_s19, %s347_s20  }
 0x247   :  { %343 = dma.done.wait [#allocation4], 256  }
 0x248   :  { %344 = vsyncadd [#allocation4], 4294967040 }
 0x249   :  { %237 = vsyncpa [#allocation3], 1 }
 0x24a   :  { %238 = vsyncpa [#allocation6], 1 }
 0x24b   :  { %239 = vsyncpa [#allocation4], 1 }

</bundles_post_ra>
